<compile_context>
chip_gen: v5e
topology: v5e:2x2
jax: 0.10.0
libtpu: 0.0.40
codegen_flags: <defaults>
</compile_context>

<pallas_src>
import jax
import jax.numpy as jnp
from jax.experimental import pallas as pl
from jax.experimental.pallas import tpu as pltpu

_SUBLANE = 8
_MAX_LANE_TILE = 2048                      # lanes per tile (multiple of 128)
_PIPELINE_VMEM_BUDGET = 16 * 1024 * 1024   # bytes for double-buffered x + out tiles


def _scale_kernel(w_ref, x_ref, o_ref):
    # w_ref: (TR, 1) per-row scale; x_ref / o_ref: (TR, TC).
    # One VPU vmul per vreg; the lane-axis broadcast of the scale is free.
    o_ref[...] = w_ref[...] * x_ref[...]


def _choose_tiles(rows, cols, itemsize):
    # Lane (last-dim) tile: keep it lane-dense (full extent, or a big multiple of 128).
    tc = cols if cols <= _MAX_LANE_TILE else _MAX_LANE_TILE

    # Row tile: multiple of 8 (or the full row extent), sized so the
    # double-buffered x + out pipeline buffers stay inside the budget on
    # every TPU generation (incl. v7x's 64 MiB physical VMEM).
    per_row_bytes = 2 * 2 * tc * itemsize   # 2 arrays (x, out) * 2 pipeline buffers
    tr = max(1, _PIPELINE_VMEM_BUDGET // per_row_bytes)
    tr = min(tr, rows, 1024)
    if rows >= _SUBLANE:
        tr = max(_SUBLANE, (tr // _SUBLANE) * _SUBLANE)
    else:
        tr = rows
    return tr, tc


def scale_module_forward(x, weight):
    """x: (N, C, H, W); weight: (1, C, 1, 1).  Returns weight * x (torch.mul)."""
    N, C, H, W = x.shape
    rows, cols = N * C, H * W
    itemsize = jnp.dtype(x.dtype).itemsize

    tr, tc = _choose_tiles(rows, cols, itemsize)
    grid = (pl.cdiv(rows, tr), pl.cdiv(cols, tc))

    # Glue: flatten NCHW -> (N*C, H*W); expand per-channel weight to a tiny
    # (N*C, 1) column so every row-tile sees its own per-row scale.
    x2d = x.reshape(rows, cols)
    w_col = jnp.broadcast_to(
        weight.reshape(1, C, 1).astype(x.dtype), (N, C, 1)
    ).reshape(rows, 1)

    out2d = pl.pallas_call(
        _scale_kernel,
        out_shape=jax.ShapeDtypeStruct((rows, cols), x.dtype),
        grid_spec=pltpu.PrefetchScalarGridSpec(
            num_scalar_prefetch=0,
            grid=grid,
            in_specs=[
                # Row-tiled weight column: only the TR rows this step needs.
                pl.BlockSpec((tr, 1), lambda i, j: (i, 0)),
                # Activation tile.
                pl.BlockSpec((tr, tc), lambda i, j: (i, j)),
            ],
            out_specs=pl.BlockSpec((tr, tc), lambda i, j: (i, j)),
        ),
        compiler_params=pltpu.CompilerParams(
            # Pure elementwise: no reduction axis; both axes can shard across
            # TensorCores on v7x (neutral on single-TC v5e/v6e).
            dimension_semantics=("parallel", "parallel"),
            # Tiles above use < ~17 MiB double-buffered, so 32 MiB scoped VMEM
            # is safe on every generation.
            vmem_limit_bytes=32 * 1024 * 1024,
        ),
        # Note: if the caller can donate x, adding input_output_aliases={1: 0}
        # reuses the activation buffer for the output (saves an allocation).
    )(w_col, x2d)

    return out2d.reshape(N, C, H, W)


if __name__ == "__main__":
    key = jax.random.PRNGKey(0)

    # Small shapes consistent with the module: NCHW input, dims=(1, C, 1, 1).
    N, C, H, W = 2, 4, 16, 16
    init_scale = 0.5

    x = jax.random.normal(key, (N, C, H, W), dtype=jnp.float32)
    # Deterministic parameter init, same as nn.Parameter(torch.ones(*dims) * init_scale).
    weight = jnp.ones((1, C, 1, 1), dtype=jnp.float32) * init_scale

    out = scale_module_forward(x, weight)
    out = jax.block_until_ready(out)

    # Reference check (plain JAX broadcasting, mirrors torch.mul semantics).
    ref = weight * x
    assert out.shape == x.shape
    assert jnp.allclose(out, ref, atol=1e-6, rtol=1e-6)

    print("KERNEL_OK")
</pallas_src>

<mosaic_0001>
module attributes {stable_mosaic.version = 11 : i64} {
  func.func @_scale_kernel(%arg0: i32, %arg1: i32, %arg2: memref<8x1xf32, #tpu.memory_space<vmem>>, %arg3: memref<8x256xf32, #tpu.memory_space<vmem>>, %arg4: memref<8x256xf32, #tpu.memory_space<vmem>>) attributes {dimension_semantics = [#tpu.dimension_semantics<parallel>, #tpu.dimension_semantics<parallel>], iteration_bounds = array<i64: 1, 1>, scalar_prefetch = 0 : i64, scratch_operands = 0 : i64, tpu.core_type = #tpu.core_type<tc>, window_params = [{transform_indices = @transform_0, window_bounds = array<i64: 8, 1>}, {transform_indices = @transform_1, window_bounds = array<i64: 8, 256>}, {transform_indices = @transform_2, window_bounds = array<i64: 8, 256>}]} {
    %c0 = arith.constant 0 : index
    %c0_0 = arith.constant 0 : index
    %0 = vector.load %arg2[%c0, %c0_0] : memref<8x1xf32, #tpu.memory_space<vmem>>, vector<8x1xf32>
    %c0_1 = arith.constant 0 : index
    %c0_2 = arith.constant 0 : index
    %1 = vector.load %arg3[%c0_1, %c0_2] : memref<8x256xf32, #tpu.memory_space<vmem>>, vector<8x256xf32>
    %2 = vector.broadcast %0 : vector<8x1xf32> to vector<8x256xf32>
    %3 = arith.mulf %2, %1 : vector<8x256xf32>
    %c0_3 = arith.constant 0 : index
    %c0_4 = arith.constant 0 : index
    %4 = vector.load %arg4[%c0_3, %c0_4] : memref<8x256xf32, #tpu.memory_space<vmem>>, vector<8x256xf32>
    tpu.vector_store %arg4[%c0_3, %c0_4], %3 {strides = array<i32>} : memref<8x256xf32, #tpu.memory_space<vmem>>, vector<8x256xf32>,
    return
  }
  func.func @transform_0(%arg0: i32, %arg1: i32) -> (i32, i32) {
    %c0_i32 = arith.constant 0 : i32
    %c0_i32_0 = arith.constant 0 : i32
    return %arg0, %c0_i32 : i32, i32
  }
  func.func @transform_1(%arg0: i32, %arg1: i32) -> (i32, i32) {
    %c0_i32 = arith.constant 0 : i32
    return %arg0, %arg1 : i32, i32
  }
  func.func @transform_2(%arg0: i32, %arg1: i32) -> (i32, i32) {
    %c0_i32 = arith.constant 0 : i32
    return %arg0, %arg1 : i32, i32
  }
}

</mosaic_0001>

<bundles_post_ra>
// kernel: tpu_custom_call.1
= control target key start
LH: loop header
LB: loop body
LE: loop exit
PB: predicated region body
PF: predicated region fallthrough
CT: control target
= control target key end

     0   :  { %7 = vsyncpa [#allocation3], 0  ;;  %s138_s0 = inlined_call_operand.vmem [shape: f32[8,1], index: 0, kind: input, shape index: {}]   ;;  %s139_s1 = inlined_call_operand.hbm [shape: f32[8,256], index: 1, kind: input, shape index: {}]   ;;  %s140_s2 = inlined_call_operand.hbm [shape: f32[8,256], index: 2, kind: output, shape index: {}]  }
   0x1   :  { %8 = vsyncpa [#allocation4], 0  ;;  %s16_s11 = sshll.u32 %s139_s1, 4  ;;  %s111_s12 = smov [#allocation2]   ;;  %s17_s11 = int_to_ptr.hbm [resolvable:$true] %s16_s11 }
   0x2   :  { %s18_s13 = sshll.u32 %s111_s12, 4  ;;  %s19_s13 = int_to_ptr.vmem [resolvable:$true] %s18_s13 }
   0x3   :  { %21 = dma.hbm_to_vmem [thread:$0]  %s17_s11, 256, %s19_s13, [#allocation3]  }
   0x4   :  { %107 = dma.done.wait [#allocation3], 256  }
   0x5   :  { %108 = vsyncadd [#allocation3], 4294967040  ;;  %v112_v0 = vmov 0   ;;  %v26_v1 = vld [vmem:[%s138_s0] sm:$0xff]  ;;  %v28_v3 = vld [vmem:[#allocation2 + $0x8] sm:$0xff]  ;;  %s113_s16 = smov [#allocation5]  }
   0x6   :  { %58 = vset.pattern.permute.xlu0 %v112_v0  ;;  %v27_v2 = vld [vmem:[#allocation2] sm:$0xff]  ;;  %s43_s17 = sshll.u32 %s113_s16, 4  ;;  %s45_s19 = sshll.u32 %s140_s2, 4  ;;  %s44_s17 = int_to_ptr.vmem [resolvable:$true] %s43_s17  ;;  %s46_s19 = int_to_ptr.hbm [resolvable:$true] %s45_s19 }
   0x7   :  { %31 = vperm.xlu0 %58, %v26_v1  }
  0x79   :  { %v32_v4 = vpop.permute.xlu0 %31 }
  0x7a   :  { %v34_v5 = vmul.f32 %v32_v4, %v27_v2  ;;  %v35_v6 = vmul.f32 %v32_v4, %v28_v3 }
  0x7c   :  { %36 = vst [vmem:[#allocation5] sm:$0xff] %v34_v5 }
  0x7d   :  { %37 = vst [vmem:[#allocation5 + $0x8] sm:$0xff] %v35_v6 }
  0x7e   :  { %48 = dma.vmem_to_hbm [thread:$0]  %s44_s17, 256, %s46_s19, [#allocation4]  }
  0x7f   :  { %109 = dma.done.wait [#allocation4], 256  }
  0x80   :  { %110 = vsyncadd [#allocation4], 4294967040 }
  0x81   :  { %53 = vsyncpa [#allocation3], 1 }
  0x82   :  { %54 = vsyncpa [#allocation4], 1 }

</bundles_post_ra>
